<compile_context>
chip_gen: v5e
topology: v5e:2x2
jax: 0.10.0
libtpu: 0.0.40
codegen_flags: <defaults>
</compile_context>

<pallas_src>
import functools

import numpy as np
import jax
import jax.numpy as jnp
from jax.experimental import pallas as pl
from jax.experimental.pallas import tpu as pltpu


# ----------------------------------------------------------------------------
# Kernel 1: tensor branch — full-plane max-pool w/ argmax + keypoint features,
#           fused into a single (rows, 3) output [value, x/w, round(idx/w)/w].
# ----------------------------------------------------------------------------
def _maxpool_keypoint_kernel(x_ref, out_ref, *, w):
    x = x_ref[...]                                            # (rows, WH) f32
    wh = x.shape[-1]
    inv_w = 1.0 / float(w)
    m = jnp.max(x, axis=-1, keepdims=True)                    # pooled value
    iota = jax.lax.broadcasted_iota(jnp.int32, x.shape, 1)
    # first flat index achieving the max (matches jnp.argmax / MaxPool2d)
    idx = jnp.min(jnp.where(x == m, iota, wh), axis=-1, keepdims=True)
    idx_f = idx.astype(jnp.float32)
    out_ref[:, 0:1] = m                                       # value
    out_ref[:, 1:2] = jnp.mod(idx_f, float(w)) * inv_w        # (index % w) / w
    out_ref[:, 2:3] = jnp.round(idx_f * inv_w) * inv_w        # round(index/w)/w


def shift_keypoint_forward_tensor(x):
    """x: (n, c, w, h) float32 with the pool kernel == full spatial plane."""
    n, c, w, h = x.shape
    nc, wh = n * c, w * h
    x2d = x.reshape(nc, wh).astype(jnp.float32)

    # Row tiling: a single block at toy sizes; 512-row blocks at scale keep the
    # double-buffered input well under the scoped-VMEM budget (v7x: 64 MiB).
    block_rows = nc if nc <= 512 else 512
    grid = (pl.cdiv(nc, block_rows),)

    kern = functools.partial(_maxpool_keypoint_kernel, w=w)
    feature = pl.pallas_call(
        kern,
        out_shape=jax.ShapeDtypeStruct((nc, 3), jnp.float32),
        grid=grid,
        in_specs=[pl.BlockSpec((block_rows, wh), lambda i: (i, 0))],
        out_specs=pl.BlockSpec((block_rows, 3), lambda i: (i, 0)),
        compiler_params=pltpu.CompilerParams(
            dimension_semantics=("parallel",)),
    )(x2d)

    # Host-side int64 edge bookkeeping (stays off the device).
    coodiante = np.array([[12, 12, 8, 7, 12, 9, 10, 2, 1, 3, 4],
                          [13, 8, 7, 6, 9, 10, 11, 1, 0, 4, 5]], dtype=np.int64)
    offsets = np.arange(n, dtype=np.int64) * 14
    edge_index = (coodiante[:, None, :] + offsets[None, :, None]).reshape(2, n * 11)
    return feature, edge_index


# ----------------------------------------------------------------------------
# Kernel 2: tuple branch — all batches in ONE grid step; per-batch dots write
#           into column ranges of the fused (n, K, Cc+Cf) output.
# ----------------------------------------------------------------------------
def _bmm_keypoint_kernel(kp_ref, coord_ref, feat_ref, out_ref):
    n_b = kp_ref.shape[0]
    cc = coord_ref.shape[1]
    # Small static batch -> unrolled loop of 2-D dots (avoids per-batch grid
    # steps; each dot is tiny so it finishes in the shadow of the DMA anyway).
    for b in range(n_b):
        kp_b = kp_ref[b]                                      # (WH, K)
        out_ref[b, :, :cc] = jax.lax.dot_general(             # (K, Cc)
            kp_b, coord_ref[b], (((0,), (1,)), ((), ())),
            preferred_element_type=jnp.float32)
        out_ref[b, :, cc:] = jax.lax.dot_general(             # (K, Cf)
            kp_b, feat_ref[b], (((0,), (1,)), ((), ())),
            preferred_element_type=jnp.float32)


def shift_keypoint_forward_tuple(keypoint, coordinate, feature):
    n, w, h, k = keypoint.shape
    wh = w * h
    kp = keypoint.reshape(n, wh, k).astype(jnp.float32)
    coord = coordinate.reshape(n, -1, wh).astype(jnp.float32)
    feat = feature.reshape(n, -1, wh).astype(jnp.float32)
    cc, cf = coord.shape[1], feat.shape[1]

    # No grid: everything fits trivially in VMEM; one invocation removes the
    # per-batch pipeline overhead and the wrapper-side HBM concat of inputs.
    out = pl.pallas_call(
        _bmm_keypoint_kernel,
        out_shape=jax.ShapeDtypeStruct((n, k, cc + cf), jnp.float32),
    )(kp, coord, feat)
    feature_out = out.reshape(n * k, cc + cf)

    # Host-side int64 edge bookkeeping (stays off the device).
    ar = np.arange(128 * 128, dtype=np.int64)
    edge = np.stack([ar % 128, ar // 128], axis=0)            # (2, 128*128)
    offsets = np.arange(n, dtype=np.int64) * 128
    index = (edge[:, None, :] + offsets[None, :, None]).reshape(2, n * 128 * 128)
    return feature_out, index


# ----------------------------------------------------------------------------
if __name__ == "__main__":
    key = jax.random.PRNGKey(0)
    k1, k2, k3, k4 = jax.random.split(key, 4)

    # ---------------- tensor branch (n=2, c=14 keypoints, spatial 16x16) ------
    n, c, w, h = 2, 14, 16, 16
    x = jax.random.normal(k1, (n, c, w, h), dtype=jnp.float32)

    feat, edges = shift_keypoint_forward_tensor(x)
    jax.block_until_ready(feat)

    # pure-JAX reference
    x2d = x.reshape(n * c, w * h)
    idx_r = jnp.argmax(x2d, axis=-1)
    val_r = jnp.max(x2d, axis=-1)
    x_r = (idx_r % w).astype(jnp.float32) / w
    y_r = jnp.round(idx_r.astype(jnp.float32) / w) / w
    feat_r = jnp.stack([val_r, x_r, y_r], axis=1)
    assert feat.shape == (n * c, 3)
    np.testing.assert_allclose(np.asarray(feat), np.asarray(feat_r), rtol=1e-5, atol=1e-5)

    # host edge-index reference (matches the PyTorch loop)
    coo = np.array([[12, 12, 8, 7, 12, 9, 10, 2, 1, 3, 4],
                    [13, 8, 7, 6, 9, 10, 11, 1, 0, 4, 5]], dtype=np.int64)
    ref_edges = np.zeros((2, n * 11), dtype=np.int64)
    for i in range(n):
        ref_edges[:, i * 11:(i + 1) * 11] = coo + i * 14
    assert edges.shape == (2, n * 11) and edges.dtype == np.int64
    np.testing.assert_array_equal(edges, ref_edges)

    # ---------------- tuple branch (small shapes) ----------------
    nt, wt, ht, kt = 2, 4, 4, 8
    cf_coord, cf_feat = 2, 4
    keypoint = jax.random.normal(k2, (nt, wt, ht, kt), dtype=jnp.float32)
    coordinate = jax.random.normal(k3, (nt, cf_coord, wt, ht), dtype=jnp.float32)
    feature_in = jax.random.normal(k4, (nt, cf_feat, wt, ht), dtype=jnp.float32)

    feat2, edges2 = shift_keypoint_forward_tuple(keypoint, coordinate, feature_in)
    jax.block_until_ready(feat2)

    # pure-JAX reference for the tuple branch
    kp2d = keypoint.reshape(nt, wt * ht, kt)
    v_ref = jnp.einsum('bcs,bsk->bkc', coordinate.reshape(nt, -1, wt * ht), kp2d)
    f_ref = jnp.einsum('bcs,bsk->bkc', feature_in.reshape(nt, -1, wt * ht), kp2d)
    feat2_ref = jnp.concatenate([v_ref, f_ref], axis=2).reshape(nt * kt, cf_coord + cf_feat)
    assert feat2.shape == (nt * kt, cf_coord + cf_feat)
    np.testing.assert_allclose(np.asarray(feat2), np.asarray(feat2_ref), rtol=1e-4, atol=1e-4)

    # host edge-index reference (matches the PyTorch loop)
    e0 = np.zeros((2, 128 * 128), dtype=np.int64)
    e0[0, :] = np.arange(128 * 128) % 128
    e0[1, :] = np.arange(128 * 128) // 128
    ref_index = np.zeros((2, nt * 128 * 128), dtype=np.int64)
    for i in range(nt):
        ref_index[:, i * 128 * 128:(i + 1) * 128 * 128] = e0 + i * 128
    assert edges2.shape == (2, nt * 128 * 128) and edges2.dtype == np.int64
    np.testing.assert_array_equal(edges2, ref_index)

    print("KERNEL_OK")
</pallas_src>

<mosaic_0001>
module attributes {stable_mosaic.version = 11 : i64} {
  func.func @_maxpool_keypoint_kernel(%arg0: i32, %arg1: memref<28x256xf32, #tpu.memory_space<vmem>>, %arg2: memref<28x3xf32, #tpu.memory_space<vmem>>) attributes {dimension_semantics = [#tpu.dimension_semantics<parallel>], iteration_bounds = array<i64: 1>, scalar_prefetch = 0 : i64, scratch_operands = 0 : i64, tpu.core_type = #tpu.core_type<tc>, window_params = [{transform_indices = @transform_0, window_bounds = array<i64: 28, 256>}, {transform_indices = @transform_1, window_bounds = array<i64: 28, 3>}]} {
    %c0 = arith.constant 0 : index
    %c0_0 = arith.constant 0 : index
    %0 = vector.load %arg1[%c0, %c0_0] : memref<28x256xf32, #tpu.memory_space<vmem>>, vector<28x256xf32>
    %cst = arith.constant dense<0xFF800000> : vector<28xf32>
    %1 = vector.multi_reduction <maximumf>, %0, %cst [1] : vector<28x256xf32> to vector<28xf32>
    %2 = vector.shape_cast %1 : vector<28xf32> to vector<28x1xf32>
    %3 = tpu.iota {dimensions = array<i32: 1>} : vector<28x256xi32>
    %4 = vector.broadcast %2 : vector<28x1xf32> to vector<28x256xf32>
    %5 = arith.cmpf oeq, %0, %4 : vector<28x256xf32>
    %c256_i32 = arith.constant 256 : i32
    %6 = vector.broadcast %c256_i32 : i32 to vector<28x256xi32>
    %7 = arith.select %5, %3, %6 : vector<28x256xi1>, vector<28x256xi32>
    %cst_1 = arith.constant dense<2147483647> : vector<28xi32>
    %8 = vector.multi_reduction <minsi>, %7, %cst_1 [1] : vector<28x256xi32> to vector<28xi32>
    %9 = vector.shape_cast %8 : vector<28xi32> to vector<28x1xi32>
    %10 = arith.sitofp %9 : vector<28x1xi32> to vector<28x1xf32>
    %c0_2 = arith.constant 0 : index
    %c0_3 = arith.constant 0 : index
    %11 = vector.load %arg2[%c0_2, %c0_3] : memref<28x3xf32, #tpu.memory_space<vmem>>, vector<28x1xf32>
    tpu.vector_store %arg2[%c0_2, %c0_3], %2 {strides = array<i32>} : memref<28x3xf32, #tpu.memory_space<vmem>>, vector<28x1xf32>,
    %cst_4 = arith.constant 1.600000e+01 : f32
    %12 = vector.broadcast %cst_4 : f32 to vector<28x1xf32>
    %13 = arith.remf %10, %12 : vector<28x1xf32>
    %cst_5 = arith.constant 0.000000e+00 : f32
    %14 = vector.broadcast %cst_5 : f32 to vector<28x1xf32>
    %15 = arith.cmpf one, %13, %14 : vector<28x1xf32>
    %cst_6 = arith.constant 0.000000e+00 : f32
    %16 = vector.broadcast %cst_6 : f32 to vector<28x1xf32>
    %17 = arith.cmpf olt, %13, %16 : vector<28x1xf32>
    %cst_7 = arith.constant 0.000000e+00 : f32
    %18 = arith.cmpf olt, %cst_4, %cst_7 : f32
    %19 = vector.broadcast %18 : i1 to vector<28x1xi1>
    %20 = vector.broadcast %19 : vector<28x1xi1> to vector<28x1xi1>
    %21 = arith.xori %17, %20 : vector<28x1xi1>
    %22 = arith.andi %21, %15 : vector<28x1xi1>
    %23 = vector.broadcast %cst_4 : f32 to vector<28x1xf32>
    %24 = arith.addf %13, %23 : vector<28x1xf32>
    %25 = arith.select %22, %24, %13 : vector<28x1xi1>, vector<28x1xf32>
    %cst_8 = arith.constant 6.250000e-02 : f32
    %26 = vector.broadcast %cst_8 : f32 to vector<28x1xf32>
    %27 = arith.mulf %25, %26 : vector<28x1xf32>
    %c0_9 = arith.constant 0 : index
    %c1 = arith.constant 1 : index
    %28 = vector.load %arg2[%c0_9, %c1] : memref<28x3xf32, #tpu.memory_space<vmem>>, vector<28x1xf32>
    tpu.vector_store %arg2[%c0_9, %c1], %27 {strides = array<i32>} : memref<28x3xf32, #tpu.memory_space<vmem>>, vector<28x1xf32>,
    %cst_10 = arith.constant 6.250000e-02 : f32
    %29 = vector.broadcast %cst_10 : f32 to vector<28x1xf32>
    %30 = arith.mulf %10, %29 : vector<28x1xf32>
    %31 = math.roundeven %30 : vector<28x1xf32>
    %cst_11 = arith.constant 6.250000e-02 : f32
    %32 = vector.broadcast %cst_11 : f32 to vector<28x1xf32>
    %33 = arith.mulf %31, %32 : vector<28x1xf32>
    %c0_12 = arith.constant 0 : index
    %c2 = arith.constant 2 : index
    %34 = vector.load %arg2[%c0_12, %c2] : memref<28x3xf32, #tpu.memory_space<vmem>>, vector<28x1xf32>
    tpu.vector_store %arg2[%c0_12, %c2], %33 {strides = array<i32>} : memref<28x3xf32, #tpu.memory_space<vmem>>, vector<28x1xf32>,
    return
  }
  func.func @transform_0(%arg0: i32) -> (i32, i32) {
    %c0_i32 = arith.constant 0 : i32
    %c0_i32_0 = arith.constant 0 : i32
    return %arg0, %c0_i32 : i32, i32
  }
  func.func @transform_1(%arg0: i32) -> (i32, i32) {
    %c0_i32 = arith.constant 0 : i32
    %c0_i32_0 = arith.constant 0 : i32
    return %arg0, %c0_i32 : i32, i32
  }
}

</mosaic_0001>

<bundles_post_ra>
// kernel: tpu_custom_call.1
= control target key start
LH: loop header
LB: loop body
LE: loop exit
PB: predicated region body
PF: predicated region fallthrough
CT: control target
= control target key end

     0   :  { %6 = vsyncpa [#allocation3], 0  ;;  %s327_s9 = smov [#allocation2]   ;;  %s328_s11 = smov 256   ;;  %s433_s0 = inlined_call_operand.hbm [shape: f32[28,256], index: 0, kind: input, shape index: {}]   ;;  %s434_s1 = inlined_call_operand.vmem [shape: f32[28,3], index: 1, kind: output, shape index: {}]  }
   0x1   :  { %s11_s8 = sshll.u32 %s433_s0, 4  ;;  %s13_s10 = sshll.u32 %s327_s9, 4  ;;  %s12_s8 = int_to_ptr.hbm [resolvable:$true] %s11_s8  ;;  %s14_s10 = int_to_ptr.vmem [resolvable:$true] %s13_s10 }
   0x2   :  { %s329_s12 = smov 16  }
   0x3   :  { %19 = dma.hbm_to_vmem [thread:$0]  %s12_s8, 1024, %s14_s10, [#allocation3], %s328_s11, %s328_s11, %s329_s12  }
   0x4   :  { %325 = dma.done.wait [#allocation3], 1024  }
   0x5   :  { %326 = vsyncadd [#allocation3], 4294966272  ;;  %vm41_vm0 = vcmask 1043456   ;;  %v26_v0 = vld [vmem:[#allocation2 + $0x10] sm:$0xff]  ;;  %v27_v1 = vld [vmem:[#allocation2 + $0x18] sm:$0xff]  ;;  %v47_v14 = vlaneseq  ;;  %vm136_vm1 = vcmask 7168  }
   0x6   :  { %v30_v2 = vld [vmem:[#allocation2 + $0x30] sm:$0xf]  ;;  %v35_v3 = vmax.f32 %v26_v0, %v27_v1  ;;  %v31_v4 = vld [vmem:[#allocation2 + $0x38] sm:$0xf]  ;;  %v28_v8 = vld [vmem:[#allocation2 + $0x20] sm:$0xff]  ;;  %vm140_vm2 = vcmask 3072  }
   0x7   :  { %v42_v5 = vsel %vm41_vm0, %v30_v2, -inf  ;;  %v43_v6 = vsel %vm41_vm0, %v31_v4, -inf  ;;  %v29_v9 = vld [vmem:[#allocation2 + $0x28] sm:$0xff]  ;;  %v24_v10 = vld [vmem:[#allocation2] sm:$0xff]  ;;  %v48_v15 = vand.u32 127, %v47_v14  ;;  %v330_v59 = vmov 16.0  }
   0x8   :  { %36 = vmax.xlane.f32.xlu1 %v35_v3  ;;  %v44_v7 = vmax.f32 %v42_v5, %v43_v6  ;;  %v25_v11 = vld [vmem:[#allocation2 + $0x8] sm:$0xff]  ;;  %v38_v12 = vmax.f32 %v28_v8, %v29_v9  ;;  %299 = vrcp.f32 %v330_v59 }
   0x9   :  { %v32_v13 = vmax.f32 %v24_v10, %v25_v11  ;;  %v49_v16 = vadd.s32 128, %v48_v15 }
   0xa   :  { %45 = vmax.xlane.f32.xlu0 %v44_v7 }
   0xe   :  { %v300_v60 = vpop.eup %299 }
   0xf   :  { %v144_v61 = vmul.f32 16.0, %v300_v60 }
  0x10   :  { %39 = vmax.xlane.f32.xlu1 %v38_v12 }
  0x11   :  { %v145_v62 = vsub.f32 1.0, %v144_v61 }
  0x12   :  { %33 = vmax.xlane.f32.xlu0 %v32_v13 }
  0x7b   :  { %v37_v17 = vpop.xlane.xlu1 %36 }
  0x7c   :  { %138 = vst.msk [vmem:[%s434_s1 + $0x8] sm:$0xff] %vm136_vm1, %v37_v17  ;;  %vm52_vm6 = vcmp.eq.f32.partialorder %v26_v0, %v37_v17  ;;  %vm53_vm7 = vcmp.eq.f32.partialorder %v27_v1, %v37_v17  ;;  %v146_v0 = vmul.f32 %v300_v60, %v145_v62 }
  0x7d   :  { %v46_v18 = vpop.xlane.xlu0 %45  ;;  %v60_v30 = vsel %vm52_vm6, %v48_v15, 256  ;;  %v61_v31 = vsel %vm53_vm7, %v49_v16, 256  ;;  %vm252_vm7 = vcmask 23568  }
  0x7e   :  { %vm56_vm3 = vcmp.eq.f32.partialorder %v30_v2, %v46_v18  ;;  %vm57_vm4 = vcmp.eq.f32.partialorder %v31_v4, %v46_v18  ;;  %141 = vst.msk [vmem:[%s434_s1 + $0x18] sm:$0xf] %vm140_vm2, %v46_v18  ;;  %vm82_vm14 = vcmp.lt.s32.totalorder %v60_v30, %v61_v31  ;;  %v147_v5 = vadd.f32 %v300_v60, %v146_v0 }
  0x7f   :  { %v64_v19 = vsel %vm56_vm3, %v48_v15, 256  ;;  %v65_v20 = vsel %vm57_vm4, %v49_v16, 256  ;;  %v83_v40 = vsel %vm82_vm14, %v60_v30, %v61_v31  ;;  %vm148_vm3 = vweird.f32 %v300_v60 }
  0x80   :  { %v114_v21 = vsel %vm41_vm0, %v64_v19, 2147483647  ;;  %v115_v22 = vsel %vm41_vm0, %v65_v20, 2147483647  ;;  %v85_v41 = vshra.s32 %v83_v40, 16  ;;  %v84_v52 = vand.u32 65535, %v83_v40 }
  0x81   :  { %vm116_vm5 = vcmp.lt.s32.totalorder %v114_v21, %v115_v22  ;;  %v363_v12 = vsel %vm148_vm3, %v300_v60, %v147_v5  ;;  %vm234_vm4 = vcmask 15368  }
  0x82   :  { %v117_v23 = vsel %vm116_vm5, %v114_v21, %v115_v22  ;;  %v87_v42 = vcvt.s32.f32 %v85_v41  ;;  %v86_v55 = vcvt.s32.f32 %v84_v52 }
  0x83   :  { %v40_v24 = vpop.xlane.xlu1 %39  ;;  %v119_v25 = vshra.s32 %v117_v23, 16  ;;  %v118_v53 = vand.u32 65535, %v117_v23 }
  0x84   :  { %vm54_vm8 = vcmp.eq.f32.partialorder %v28_v8, %v40_v24  ;;  %vm55_vm9 = vcmp.eq.f32.partialorder %v29_v9, %v40_v24  ;;  %139 = vst.msk [vmem:[%s434_s1 + $0x10] sm:$0xff] %vm136_vm1, %v40_v24 }
  0x85   :  { %v62_v26 = vsel %vm54_vm8, %v48_v15, 256  ;;  %v63_v27 = vsel %vm55_vm9, %v49_v16, 256  ;;  %v34_v28 = vpop.xlane.xlu0 %33  ;;  %v121_v29 = vcvt.s32.f32 %v119_v25  ;;  %v120_v56 = vcvt.s32.f32 %v118_v53 }
  0x86   :  { %vm50_vm10 = vcmp.eq.f32.partialorder %v24_v10, %v34_v28  ;;  %vm51_vm11 = vcmp.eq.f32.partialorder %v25_v11, %v34_v28  ;;  %137 = vst.msk [vmem:[%s434_s1] sm:$0xff] %vm136_vm1, %v34_v28  ;;  %vm98_vm12 = vcmp.lt.s32.totalorder %v62_v26, %v63_v27 }
  0x87   :  { %v58_v32 = vsel %vm50_vm10, %v48_v15, 256  ;;  %v59_v33 = vsel %vm51_vm11, %v49_v16, 256  ;;  %122 = vmin.xlane.f32.xlu1 %v121_v29  ;;  %v99_v34 = vsel %vm98_vm12, %v62_v26, %v63_v27 }
  0x88   :  { %v101_v35 = vshra.s32 %v99_v34, 16  ;;  %vm66_vm13 = vcmp.lt.s32.totalorder %v58_v32, %v59_v33  ;;  %v100_v43 = vand.u32 65535, %v99_v34 }
  0x89   :  { %v67_v36 = vsel %vm66_vm13, %v58_v32, %v59_v33 }
  0x8a   :  { %v103_v37 = vcvt.s32.f32 %v101_v35  ;;  %v69_v38 = vshra.s32 %v67_v36, 16  ;;  %v68_v44 = vand.u32 65535, %v67_v36  ;;  %v102_v46 = vcvt.s32.f32 %v100_v43 }
  0x8c   :  { %104 = vmin.xlane.f32.xlu0 %v103_v37  ;;  %v71_v39 = vcvt.s32.f32 %v69_v38  ;;  %v70_v49 = vcvt.s32.f32 %v68_v44 }
  0x8e   :  { %72 = vmin.xlane.f32.xlu2 %v71_v39 }
  0x96   :  { %88 = vmin.xlane.f32.xlu2 %v87_v42 }
  0xfa   :  { %v123_v51 = vpop.xlane.xlu1 %122 }
  0xfb   :  { %vm124_vm1 = vcmp.eq.f32.partialorder %v121_v29, %v123_v51  ;;  %v129_v13 = vcvt.f32.s32 %v123_v51 }
  0xfc   :  { %v125_v58 = vsel %vm124_vm1, %v120_v56, inf }
  0xfd   :  { %v130_v24 = vshll.u32 %v129_v13, 16 }
  0xff   :  { %v105_v45 = vpop.xlane.xlu0 %104 }
 0x100   :  { %vm106_vm15 = vcmp.eq.f32.partialorder %v103_v37, %v105_v45  ;;  %v111_v63 = vcvt.f32.s32 %v105_v45 }
 0x101   :  { %v73_v47 = vpop.xlane.xlu2 %72  ;;  %v107_v48 = vsel %vm106_vm15, %v102_v46, inf }
 0x102   :  { %108 = vmin.xlane.f32.xlu1 %v107_v48  ;;  %vm74_vm0 = vcmp.eq.f32.partialorder %v71_v39, %v73_v47  ;;  %v79_v1 = vcvt.f32.s32 %v73_v47  ;;  %v112_v3 = vshll.u32 %v111_v63, 16 }
 0x103   :  { %v75_v50 = vsel %vm74_vm0, %v70_v49, inf }
 0x104   :  { %76 = vmin.xlane.f32.xlu2 %v75_v50  ;;  %v80_v7 = vshll.u32 %v79_v1, 16 }
 0x109   :  { %v89_v54 = vpop.xlane.xlu2 %88 }
 0x10a   :  { %vm90_vm2 = vcmp.eq.f32.partialorder %v87_v42, %v89_v54  ;;  %v95_v17 = vcvt.f32.s32 %v89_v54 }
 0x10b   :  { %v91_v57 = vsel %vm90_vm2, %v86_v55, inf }
 0x10c   :  { %92 = vmin.xlane.f32.xlu0 %v91_v57  ;;  %126 = vmin.xlane.f32.xlu2 %v125_v58  ;;  %v96_v28 = vshll.u32 %v95_v17, 16 }
 0x175   :  { %v109_v2 = vpop.xlane.xlu1 %108 }
 0x176   :  { %v110_v4 = vcvt.f32.s32 %v109_v2 }
 0x177   :  { %v77_v6 = vpop.xlane.xlu2 %76 }
 0x178   :  { %v113_v8 = vadd.s32 %v112_v3, %v110_v4  ;;  %v78_v9 = vcvt.f32.s32 %v77_v6 }
 0x17a   :  { %v134_v10 = vcvt.s32.f32 %v113_v8  ;;  %v81_v11 = vadd.s32 %v80_v7, %v78_v9 }
 0x17c   :  { %v176_v14 = vand.u32 2147483647, %v134_v10  ;;  %v242_v15 = vmul.f32 0.0625, %v134_v10  ;;  %v132_v16 = vcvt.s32.f32 %v81_v11  ;;  %v191_v44 = vand.u32 2147483648, %v134_v10 }
 0x17e   :  { %v184_v18 = vmul.f32 %v176_v14, %v363_v12  ;;  %v281_v19 = vcvt.f32.s32 %v242_v15  ;;  %v142_v20 = vand.u32 2147483647, %v132_v16  ;;  %v366_v21 = vmul.f32 0.0625, %v132_v16 }
 0x17f   :  { %v127_v22 = vpop.xlane.xlu2 %126  ;;  %v93_v23 = vpop.xlane.xlu0 %92  ;;  %v279_v35 = vand.u32 2147483647, %v242_v15  ;;  %v284_v36 = vand.u32 2147483648, %v242_v15  ;;  %v157_v62 = vand.u32 2147483648, %v132_v16 }
 0x180   :  { %v185_v25 = vfloor.f32 %v184_v18  ;;  %v282_v26 = vcvt.s32.f32 %v281_v19  ;;  %v128_v27 = vcvt.f32.s32 %v127_v22  ;;  %v150_v29 = vmul.f32 %v363_v12, %v142_v20 }
 0x181   :  { %v265_v30 = vcvt.f32.s32 %v366_v21  ;;  %v94_v34 = vcvt.f32.s32 %v93_v23  ;;  %vm373_vm6 = vcmp.lt.f32.partialorder %v279_v35, 8388608.0  ;;  %v263_v50 = vand.u32 2147483647, %v366_v21 }
 0x182   :  { %v186_v31 = vmul.f32 16.0, %v185_v25  ;;  %v283_v32 = vand.u32 2147483647, %v282_v26  ;;  %v131_v33 = vadd.s32 %v130_v24, %v128_v27  ;;  %v151_v37 = vfloor.f32 %v150_v29 }
 0x183   :  { %v266_v38 = vcvt.s32.f32 %v265_v30  ;;  %v97_v43 = vadd.s32 %v96_v28, %v94_v34  ;;  %v268_v52 = vand.u32 2147483648, %v366_v21  ;;  %vm387_vm9 = vcmp.lt.f32.partialorder %v263_v50, 8388608.0 }
 0x184   :  { %v187_v39 = vsub.f32 %v176_v14, %v186_v31  ;;  %v370_v40 = vcvt.s32.f32 %v131_v33  ;;  %v285_v41 = vor.u32 %v284_v36, %v283_v32  ;;  %v152_v42 = vmul.f32 16.0, %v151_v37 }
 0x185   :  { %v267_v45 = vand.u32 2147483647, %v266_v38  ;;  %v385_v56 = vcvt.s32.f32 %v97_v43 }
 0x186   :  { %vm188_vm5 = vcmp.eq.f32.partialorder %v187_v39, 16.0  ;;  %v193_v46 = vand.u32 2147483647, %v370_v40  ;;  %v153_v49 = vsub.f32 %v142_v20, %v152_v42  ;;  %v381_v54 = vmul.f32 0.0625, %v370_v40 }
 0x187   :  { %v189_v47 = vsel %vm188_vm5, 0.0, %v187_v39  ;;  %v286_v55 = vsel %vm373_vm6, %v285_v41, %v242_v15  ;;  %v269_v59 = vor.u32 %v268_v52, %v267_v45  ;;  %v159_v6 = vand.u32 2147483647, %v385_v56 }
 0x188   :  { %v190_v51 = vand.u32 2147483647, %v189_v47  ;;  %v201_v53 = vmul.f32 %v193_v46, %v363_v12  ;;  %vm154_vm8 = vcmp.eq.f32.partialorder %v153_v49, 16.0  ;;  %v289_v0 = vcvt.f32.s32 %v381_v54 }
 0x189   :  { %v155_v58 = vsel %vm154_vm8, 0.0, %v153_v49  ;;  %v250_v3 = vmul.f32 0.0625, %v286_v55  ;;  %v270_v8 = vsel %vm387_vm9, %v269_v59, %v366_v21  ;;  %v241_v10 = vmul.f32 0.0625, %v385_v56 }
 0x18a   :  { %v192_v57 = vor.u32 %v191_v44, %v190_v51  ;;  %v202_v60 = vfloor.f32 %v201_v53  ;;  %v156_v61 = vand.u32 2147483647, %v155_v58  ;;  %v290_v5 = vcvt.s32.f32 %v289_v0 }
 0x18b   :  { %v287_v14 = vand.u32 2147483647, %v381_v54  ;;  %v167_v16 = vmul.f32 %v159_v6, %v363_v12  ;;  %v292_v19 = vand.u32 2147483648, %v381_v54  ;;  %v273_v20 = vcvt.f32.s32 %v241_v10 }
 0x18c   :  { %vm212_vm10 = vcmp.ne.f32.partialorder %v192_v57, 0.0  ;;  %vm216_vm11 = vcmp.lt.f32.partialorder %v192_v57, 0.0  ;;  %v224_v1 = vadd.f32 16.0, %v192_v57  ;;  %v203_v2 = vmul.f32 16.0, %v202_v60 }
 0x18d   :  { %vm220_vm12 = vmand %vm216_vm11, %vm212_vm10  ;;  %v158_v4 = vor.u32 %v157_v62, %v156_v61  ;;  %v291_v15 = vand.u32 2147483647, %v290_v5  ;;  %v208_v23 = vand.u32 2147483648, %v370_v40  ;;  %v168_v12 = vfloor.f32 %v167_v16 }
 0x18e   :  { %v228_v7 = vsel %vm220_vm12, %v224_v1, %v192_v57  ;;  %v204_v9 = vsub.f32 %v193_v46, %v203_v2  ;;  %v248_v24 = vmul.f32 0.0625, %v270_v8  ;;  %v274_v26 = vcvt.s32.f32 %v273_v20 }
 0x18f   :  { %v232_v11 = vmul.f32 0.0625, %v228_v7  ;;  %vm210_vm13 = vcmp.ne.f32.partialorder %v158_v4, 0.0  ;;  %vm214_vm14 = vcmp.lt.f32.partialorder %v158_v4, 0.0  ;;  %v222_v13 = vadd.f32 16.0, %v158_v4 }
 0x190   :  { %vm218_vm15 = vmand %vm214_vm14, %vm210_vm13  ;;  %vm205_vm0 = vcmp.eq.f32.partialorder %v204_v9, 16.0  ;;  %v293_v25 = vor.u32 %v292_v19, %v291_v15  ;;  %v169_v28 = vmul.f32 16.0, %v168_v12  ;;  %vm288_vm1 = vcmp.lt.f32.partialorder %v287_v14, 8388608.0 }
 0x191   :  { %237 = vst.msk [vmem:[%s434_s1 + $0x10] sm:$0xff] %vm234_vm4, %v232_v11  ;;  %v226_v17 = vsel %vm218_vm15, %v222_v13, %v158_v4  ;;  %v206_v18 = vsel %vm205_vm0, 0.0, %v204_v9  ;;  %v275_v32 = vand.u32 2147483647, %v274_v26  ;;  %vm238_vm6 = vcmask 11272  }
 0x192   :  { %255 = vst.msk [vmem:[%s434_s1 + $0x10] sm:$0xff] %vm252_vm7, %v250_v3  ;;  %v230_v21 = vmul.f32 0.0625, %v226_v17  ;;  %v207_v22 = vand.u32 2147483647, %v206_v18  ;;  %v170_v30 = vsub.f32 %v159_v6, %v169_v28  ;;  %v294_v31 = vsel %vm288_vm1, %v293_v25, %v381_v54 }
 0x193   :  { %vm256_vm9 = vcmask 19472   ;;  %v276_v36 = vand.u32 2147483648, %v241_v10  ;;  %v251_v37 = vmul.f32 0.0625, %v294_v31  ;;  %v174_v39 = vand.u32 2147483648, %v385_v56 }
 0x194   :  { %235 = vst.msk [vmem:[%s434_s1] sm:$0xff] %vm234_vm4, %v230_v21  ;;  %v209_v27 = vor.u32 %v208_v23, %v207_v22  ;;  %vm171_vm8 = vcmp.eq.f32.partialorder %v170_v30, 16.0  ;;  %v271_v40 = vand.u32 2147483647, %v241_v10 }
 0x195   :  { %253 = vst.msk [vmem:[%s434_s1] sm:$0xff] %vm252_vm7, %v248_v24  ;;  %v172_v35 = vsel %vm171_vm8, 0.0, %v170_v30  ;;  %v277_v41 = vor.u32 %v276_v36, %v275_v32 }
 0x196   :  { %vm213_vm2 = vcmp.ne.f32.partialorder %v209_v27, 0.0  ;;  %vm217_vm3 = vcmp.lt.f32.partialorder %v209_v27, 0.0  ;;  %v225_v29 = vadd.f32 16.0, %v209_v27  ;;  %v173_v38 = vand.u32 2147483647, %v172_v35 }
 0x197   :  { %vm221_vm5 = vmand %vm217_vm3, %vm213_vm2  ;;  %vm272_vm12 = vcmp.lt.f32.partialorder %v271_v40, 8388608.0 }
 0x198   :  { %v229_v33 = vsel %vm221_vm5, %v225_v29, %v209_v27  ;;  %v175_v42 = vor.u32 %v174_v39, %v173_v38  ;;  %v278_v44 = vsel %vm272_vm12, %v277_v41, %v241_v10 }
 0x199   :  { %v233_v34 = vmul.f32 0.0625, %v229_v33  ;;  %v249_v47 = vmul.f32 0.0625, %v278_v44 }
 0x19a   :  { %vm211_vm10 = vcmp.ne.f32.partialorder %v175_v42, 0.0  ;;  %vm215_vm11 = vcmp.lt.f32.partialorder %v175_v42, 0.0  ;;  %v223_v43 = vadd.f32 16.0, %v175_v42 }
 0x19b   :  { %239 = vst.msk [vmem:[%s434_s1 + $0x18] sm:$0xf] %vm238_vm6, %v233_v34  ;;  %vm219_vm13 = vmand %vm215_vm11, %vm211_vm10 }
 0x19c   :  { %257 = vst.msk [vmem:[%s434_s1 + $0x18] sm:$0xf] %vm256_vm9, %v251_v37  ;;  %v227_v45 = vsel %vm219_vm13, %v223_v43, %v175_v42 }
 0x19d   :  { %v231_v46 = vmul.f32 0.0625, %v227_v45 }
 0x19f   :  { %236 = vst.msk [vmem:[%s434_s1 + $0x8] sm:$0xff] %vm234_vm4, %v231_v46 }
 0x1a0   :  { %254 = vst.msk [vmem:[%s434_s1 + $0x8] sm:$0xff] %vm252_vm7, %v249_v47 }
 0x1a1   :  { %262 = vsyncpa [#allocation3], 1 }

</bundles_post_ra>
